<compile_context>
chip_gen: v7x
topology: tpu7x:2x2x1
jax: 0.10.0
libtpu: 0.0.40
codegen_flags: <defaults>
</compile_context>

<pallas_src>
import functools

import jax
import jax.numpy as jnp
from jax.experimental import pallas as pl
from jax.experimental.pallas import tpu as pltpu


def _vmem_capacity_bytes():
    """Physical VMEM of the current TPU generation (fallback: v7x's 64 MiB)."""
    try:
        info = pltpu.get_tpu_info()
        cap = getattr(info, "vmem_capacity_bytes", None)
        if cap:
            return int(cap)
    except Exception:
        pass
    return 64 * 1024 * 1024


def _adain_kernel(x_ref, w_ref, b_ref, o_ref, *, eps, inv_hw):
    # x_ref: (TR, HW) block of instances; w_ref / b_ref: (TR, 1) per-block.
    # Garbage rows in a partial last block only affect rows that are never
    # written back (all math is row-wise), so no sublane masking is needed.
    x = x_ref[...].astype(jnp.float32)

    # Two-pass statistics in f32 (biased variance, matching training-mode BN).
    mean = jnp.sum(x, axis=-1, keepdims=True) * inv_hw
    xc = x - mean
    var = jnp.sum(xc * xc, axis=-1, keepdims=True) * inv_hw
    inv = jax.lax.rsqrt(var + eps)

    scale = inv * w_ref[...].astype(jnp.float32)
    shift = b_ref[...].astype(jnp.float32)
    o_ref[...] = (xc * scale + shift).astype(o_ref.dtype)


def adaptive_instance_norm_2d(x, weight, bias, eps=1e-5):
    """x: (B, C, H, W); weight, bias: (B*C,). Returns (B, C, H, W)."""
    B, C, H, W = x.shape
    BC, HW = B * C, H * W

    dtype_bytes = jnp.dtype(x.dtype).itemsize
    sublane = {4: 8, 2: 16, 1: 32}.get(dtype_bytes, 8)

    # Generation-aware VMEM budget.
    cap = _vmem_capacity_bytes()
    if cap >= 100 * 1024 * 1024:           # v5e / v6e: 128 MiB physical VMEM
        vmem_limit = 96 * 1024 * 1024
        footprint_target = 72 * 1024 * 1024
    else:                                   # v7x: 64 MiB physical VMEM
        vmem_limit = 48 * 1024 * 1024
        footprint_target = 36 * 1024 * 1024

    # Per-row VMEM footprint: 2x input block + 2x output block (double
    # buffering) + ~2 blocks worth of f32 temporaries (upcast x, centered x).
    per_row_bytes = HW * (4 * dtype_bytes + 8)
    rows_budget = (footprint_target // per_row_bytes) // sublane * sublane
    rows_budget = max(rows_budget, sublane)
    # TODO(synk): if even `sublane` rows exceed the VMEM limit (astronomically
    # large H*W) a spatial split of the reduction would be required.

    if BC <= sublane:
        TR = BC                             # full-dim block: no alignment needed
    else:
        tr_max = (BC // sublane) * sublane  # largest sublane-aligned tile <= BC
        # Target >= ~8 grid steps (>= 4 per TensorCore on v7x) when BC allows,
        # so the per-core BlockSpec pipeline actually overlaps DMA and compute.
        tr_cap = max(sublane, ((BC // 8) // sublane) * sublane)
        TR = max(sublane, min(rows_budget, tr_max, tr_cap))
    grid = (pl.cdiv(BC, TR),)

    # Free (contiguous-view) reshapes; no wrapper-side padding or copies.
    x2d = x.reshape(BC, HW)
    w2d = weight.reshape(BC, 1)
    b2d = bias.reshape(BC, 1)

    kernel = functools.partial(_adain_kernel, eps=eps, inv_hw=1.0 / HW)
    out2d = pl.pallas_call(
        kernel,
        out_shape=jax.ShapeDtypeStruct((BC, HW), x.dtype),
        grid_spec=pltpu.PrefetchScalarGridSpec(
            num_scalar_prefetch=0,
            grid=grid,
            in_specs=[
                pl.BlockSpec((TR, HW), lambda i: (i, 0)),
                pl.BlockSpec((TR, 1), lambda i: (i, 0)),
                pl.BlockSpec((TR, 1), lambda i: (i, 0)),
            ],
            out_specs=pl.BlockSpec((TR, HW), lambda i: (i, 0)),
        ),
        compiler_params=pltpu.CompilerParams(
            dimension_semantics=("parallel",),
            vmem_limit_bytes=vmem_limit,
        ),
    )(x2d, w2d, b2d)

    return out2d.reshape(B, C, H, W)


def _reference(x, weight, bias, eps=1e-5):
    B, C, H, W = x.shape
    xf = x.reshape(B * C, H * W).astype(jnp.float32)
    mean = jnp.mean(xf, axis=-1, keepdims=True)
    var = jnp.mean(jnp.square(xf - mean), axis=-1, keepdims=True)
    y = (xf - mean) / jnp.sqrt(var + eps) * weight[:, None].astype(jnp.float32) \
        + bias[:, None].astype(jnp.float32)
    return y.reshape(B, C, H, W).astype(x.dtype)


if __name__ == "__main__":
    key = jax.random.PRNGKey(0)
    ks = jax.random.split(key, 9)

    # Case 1: aligned shapes (B*C multiple of 8, H*W multiple of 128).
    B, C, H, W = 2, 4, 16, 16
    x = jax.random.normal(ks[0], (B, C, H, W), dtype=jnp.float32)
    # AdaIN weight/bias are assigned externally (e.g. from a style MLP);
    # they have shape (B * num_features,).
    weight = jax.random.normal(ks[1], (B * C,), dtype=jnp.float32) * 0.5 + 1.0
    bias = jax.random.normal(ks[2], (B * C,), dtype=jnp.float32) * 0.1
    out = jax.block_until_ready(adaptive_instance_norm_2d(x, weight, bias, eps=1e-5))
    ref = _reference(x, weight, bias, eps=1e-5)
    assert out.shape == (B, C, H, W)
    assert jnp.max(jnp.abs(out - ref)) < 1e-4, "mismatch vs reference (aligned)"

    # Case 2: ragged, single full-array block (B*C < 8, H*W not mult of 128).
    B2, C2, H2, W2 = 2, 3, 7, 9
    x2 = jax.random.normal(ks[3], (B2, C2, H2, W2), dtype=jnp.float32)
    weight2 = jax.random.normal(ks[4], (B2 * C2,), dtype=jnp.float32) * 0.5 + 1.0
    bias2 = jax.random.normal(ks[5], (B2 * C2,), dtype=jnp.float32) * 0.1
    out2 = jax.block_until_ready(adaptive_instance_norm_2d(x2, weight2, bias2, eps=1e-5))
    ref2 = _reference(x2, weight2, bias2, eps=1e-5)
    assert out2.shape == (B2, C2, H2, W2)
    assert jnp.max(jnp.abs(out2 - ref2)) < 1e-4, "mismatch vs reference (ragged)"

    # Case 3: multi-step grid with a masked partial last row-block
    # (B*C = 20 not a multiple of TR, H*W = 100 not a multiple of 128).
    B3, C3, H3, W3 = 5, 4, 10, 10
    x3 = jax.random.normal(ks[6], (B3, C3, H3, W3), dtype=jnp.float32)
    weight3 = jax.random.normal(ks[7], (B3 * C3,), dtype=jnp.float32) * 0.5 + 1.0
    bias3 = jax.random.normal(ks[8], (B3 * C3,), dtype=jnp.float32) * 0.1
    out3 = jax.block_until_ready(adaptive_instance_norm_2d(x3, weight3, bias3, eps=1e-5))
    ref3 = _reference(x3, weight3, bias3, eps=1e-5)
    assert out3.shape == (B3, C3, H3, W3)
    assert jnp.max(jnp.abs(out3 - ref3)) < 1e-4, "mismatch vs reference (partial block)"

    print("KERNEL_OK")
</pallas_src>

<mosaic_0001>
module attributes {stable_mosaic.version = 11 : i64} {
  func.func @_adain_kernel(%arg0: i32, %arg1: memref<8x256xf32, #tpu.memory_space<vmem>>, %arg2: memref<8x1xf32, #tpu.memory_space<vmem>>, %arg3: memref<8x1xf32, #tpu.memory_space<vmem>>, %arg4: memref<8x256xf32, #tpu.memory_space<vmem>>) attributes {dimension_semantics = [#tpu.dimension_semantics<parallel>], iteration_bounds = array<i64: 1>, scalar_prefetch = 0 : i64, scratch_operands = 0 : i64, tpu.core_type = #tpu.core_type<tc>, window_params = [{transform_indices = @transform_0, window_bounds = array<i64: 8, 256>}, {transform_indices = @transform_1, window_bounds = array<i64: 8, 1>}, {transform_indices = @transform_2, window_bounds = array<i64: 8, 1>}, {transform_indices = @transform_3, window_bounds = array<i64: 8, 256>}]} {
    %c0 = arith.constant 0 : index
    %c0_0 = arith.constant 0 : index
    %0 = vector.load %arg1[%c0, %c0_0] : memref<8x256xf32, #tpu.memory_space<vmem>>, vector<8x256xf32>
    %cst = arith.constant dense<0.000000e+00> : vector<8xf32>
    %1 = vector.multi_reduction <add>, %0, %cst [1] : vector<8x256xf32> to vector<8xf32>
    %2 = vector.shape_cast %1 : vector<8xf32> to vector<8x1xf32>
    %cst_1 = arith.constant 3.906250e-03 : f32
    %3 = vector.broadcast %cst_1 : f32 to vector<8x1xf32>
    %4 = arith.mulf %2, %3 : vector<8x1xf32>
    %5 = vector.broadcast %4 : vector<8x1xf32> to vector<8x256xf32>
    %6 = arith.subf %0, %5 : vector<8x256xf32>
    %7 = arith.mulf %6, %6 : vector<8x256xf32>
    %cst_2 = arith.constant dense<0.000000e+00> : vector<8xf32>
    %8 = vector.multi_reduction <add>, %7, %cst_2 [1] : vector<8x256xf32> to vector<8xf32>
    %9 = vector.shape_cast %8 : vector<8xf32> to vector<8x1xf32>
    %cst_3 = arith.constant 3.906250e-03 : f32
    %10 = vector.broadcast %cst_3 : f32 to vector<8x1xf32>
    %11 = arith.mulf %9, %10 : vector<8x1xf32>
    %cst_4 = arith.constant 9.99999974E-6 : f32
    %12 = vector.broadcast %cst_4 : f32 to vector<8x1xf32>
    %13 = arith.addf %11, %12 : vector<8x1xf32>
    %14 = math.rsqrt %13 : vector<8x1xf32>
    %c0_5 = arith.constant 0 : index
    %c0_6 = arith.constant 0 : index
    %15 = vector.load %arg2[%c0_5, %c0_6] : memref<8x1xf32, #tpu.memory_space<vmem>>, vector<8x1xf32>
    %16 = arith.mulf %14, %15 : vector<8x1xf32>
    %c0_7 = arith.constant 0 : index
    %c0_8 = arith.constant 0 : index
    %17 = vector.load %arg3[%c0_7, %c0_8] : memref<8x1xf32, #tpu.memory_space<vmem>>, vector<8x1xf32>
    %18 = vector.broadcast %16 : vector<8x1xf32> to vector<8x256xf32>
    %19 = arith.mulf %6, %18 : vector<8x256xf32>
    %20 = vector.broadcast %17 : vector<8x1xf32> to vector<8x256xf32>
    %21 = arith.addf %19, %20 : vector<8x256xf32>
    %c0_9 = arith.constant 0 : index
    %c0_10 = arith.constant 0 : index
    %22 = vector.load %arg4[%c0_9, %c0_10] : memref<8x256xf32, #tpu.memory_space<vmem>>, vector<8x256xf32>
    tpu.vector_store %arg4[%c0_9, %c0_10], %21 {strides = array<i32>} : memref<8x256xf32, #tpu.memory_space<vmem>>, vector<8x256xf32>,
    return
  }
  func.func @transform_0(%arg0: i32) -> (i32, i32) {
    %c0_i32 = arith.constant 0 : i32
    %c0_i32_0 = arith.constant 0 : i32
    return %arg0, %c0_i32 : i32, i32
  }
  func.func @transform_1(%arg0: i32) -> (i32, i32) {
    %c0_i32 = arith.constant 0 : i32
    %c0_i32_0 = arith.constant 0 : i32
    return %arg0, %c0_i32 : i32, i32
  }
  func.func @transform_2(%arg0: i32) -> (i32, i32) {
    %c0_i32 = arith.constant 0 : i32
    %c0_i32_0 = arith.constant 0 : i32
    return %arg0, %c0_i32 : i32, i32
  }
  func.func @transform_3(%arg0: i32) -> (i32, i32) {
    %c0_i32 = arith.constant 0 : i32
    %c0_i32_0 = arith.constant 0 : i32
    return %arg0, %c0_i32 : i32, i32
  }
}

</mosaic_0001>

<bundles_post_ra>
// kernel: tpu_custom_call.1
= control target key start
LH: loop header
LB: loop body
LE: loop exit
PB: predicated region body
PF: predicated region fallthrough
CT: control target
= control target key end

     0   :  { %s140_s0 = inlined_call_operand.vmem [shape: f32[8,256], index: 0, kind: input, shape index: {}]   ;;  %s141_s1 = inlined_call_operand.vmem [shape: f32[8,1], index: 1, kind: input, shape index: {}]   ;;  %s142_s2 = inlined_call_operand.vmem [shape: f32[8,1], index: 2, kind: input, shape index: {}]   ;;  %s143_s3 = inlined_call_operand.hbm [shape: f32[8,256], index: 3, kind: output, shape index: {}]  }
   0x1   :  { %v15_v0 = vld [vmem:[%s140_s0] sm:$0xff]  ;;  %v16_v1 = vld [vmem:[%s140_s0 + $0x8] sm:$0xff] }
   0x2   :  { %8 = vsyncpa [#allocation3], 0  ;;  %v17_v2 = vadd.f32 %v16_v1, %v15_v0  ;;  %v94_v10 = vmov 0   ;;  %v31_v14 = vld [vmem:[%s141_s1] sm:$0xff]  ;;  %s95_s19 = smov [#allocation2]  }
   0x3   :  { %66 = vset.pattern.permute.xlu1 %v94_v10  ;;  %67 = vset.pattern.permute.xlu0 %v94_v10  ;;  %v33_v17 = vld [vmem:[%s142_s2] sm:$0xff]  ;;  %s56_s20 = sshll.u32 %s95_s19, 4  ;;  %s57_s20 = int_to_ptr.vmem [resolvable:$true] %s56_s20 }
   0x4   :  { %18 = vadd.xlane.f32.xlu0 %v17_v2  ;;  %s70_s1 = scalar_lea.vmem %s57_s20, 256  ;;  %p75_p1 = scmp.lt.s32.totalorder %s57_s20, %s57_s20 }
   0x5   :  { %p71_p0 = scmp.ne.s32.totalorder %s57_s20, %s70_s1  ;;  %p76_p2 = scmp.lt.s32.totalorder %s70_s1, %s70_s1 }
   0x7   :  { %p77_p3 = por %p76_p2, %p75_p1 }
   0x9   :  { %p78_p4 = pnand %p77_p3, %p71_p0 }
  0x91   :  { %v19_v3 = vpop.xlane.xlu0 %18 }
  0x92   :  { %v20_v4 = vmul.f32 0.00390625, %v19_v3 }
  0x94   :  { %v21_v5 = vsub.f32 %v15_v0, %v20_v4  ;;  %v22_v6 = vsub.f32 %v16_v1, %v20_v4 }
  0x96   :  { %v23_v7 = vmul.f32 %v21_v5, %v21_v5  ;;  %v24_v8 = vmul.f32 %v22_v6, %v22_v6 }
  0x98   :  { %v25_v9 = vadd.f32 %v24_v8, %v23_v7 }
  0x9a   :  { %26 = vadd.xlane.f32.xlu0 %v25_v9 }
 0x127   :  { %v27_v11 = vpop.xlane.xlu0 %26 }
 0x128   :  { %v28_v12 = vmul.f32 0.00390625, %v27_v11 }
 0x12a   :  { %v29_v13 = vadd.f32 1e-05, %v28_v12 }
 0x12c   :  { %68 = vrsqrt.f32 %v29_v13 }
 0x136   :  { %v69_v15 = vpop.eup %68 }
 0x137   :  { %v32_v16 = vmul.f32 %v69_v15, %v31_v14 }
 0x139   :  { %36 = vperm.xlu1 %66, %v32_v16  }
 0x13d   :  { %43 = vperm.xlu1 %66, %v33_v17  }
 0x1b8   :  { %v37_v18 = vpop.permute.xlu1 %36 }
 0x1b9   :  { %v39_v19 = vmul.f32 %v37_v18, %v21_v5  ;;  %v40_v20 = vmul.f32 %v37_v18, %v22_v6 }
 0x1bc   :  { %v44_v21 = vpop.permute.xlu1 %43 }
 0x1bd   :  { %v46_v22 = vadd.f32 %v44_v21, %v39_v19  ;;  %v47_v23 = vadd.f32 %v44_v21, %v40_v20 }
 0x1bf   :  { %48 = vst [vmem:[#allocation2] sm:$0xff] %v46_v22  ;;  %49 = vst [vmem:[#allocation2 + $0x8] sm:$0xff] %v47_v23 }
 0x1c0   :  { %81 = shalt.err (!%p78_p4)
}
 0x1c1   :  { %s82_s22 = scalar_lea.hbm %s143_s3, 256 }
 0x1c2   :  { %p83_p5 = scmp.ne.s32.totalorder %s143_s3, %s82_s22  ;;  %p86_p6 = scmp.lt.u32.totalorder %s82_s22, %s143_s3 }
 0x1c4   :  { %p88_p7 = pnand %p86_p6, %p83_p5 }
 0x1c6   :  { %91 = shalt.err (!%p88_p7)
}
 0x1c7   :  { %59 = dma.vmem_to_hbm [thread:$0]  %s57_s20, 256, %s143_s3, [#allocation3]  }
 0x1c8   :  { %92 = dma.done.wait [#allocation3], 256  }
 0x1c9   :  { %93 = vsyncadd [#allocation3], 4294967040 }
 0x1ca   :  { %63 = vsyncpa [#allocation3], 1 }

</bundles_post_ra>
